<compile_context>
chip_gen: v7x
topology: tpu7x:2x2x1
jax: 0.10.0
libtpu: 0.0.40
codegen_flags: <defaults>
</compile_context>

<pallas_src>
import functools

import jax
import jax.numpy as jnp
from jax.experimental import pallas as pl
from jax.experimental.pallas import tpu as pltpu


def fm_dense_kernel(x_ref, o_ref):
    """One (TB, F, D) tile -> (TB, 1) second-order interaction.

    Accumulates per-field slices in f32 (VALU adds), then reduces over the
    lane (embed) axis once.
    """
    num_fields = x_ref.shape[1]

    x0 = x_ref[:, 0, :].astype(jnp.float32)          # (TB, D)
    s = x0                                           # running sum over fields
    ssq = x0 * x0                                    # running sum of squares
    for f in range(1, num_fields):                   # F is small & static -> unroll
        xf = x_ref[:, f, :].astype(jnp.float32)
        s = s + xf
        ssq = ssq + xf * xf

    # 0.5 * sum_d[(sum_f x)^2 - sum_f x^2]
    interaction = 0.5 * jnp.sum(s * s - ssq, axis=-1, keepdims=True)  # (TB, 1)
    o_ref[...] = interaction.astype(o_ref.dtype)


def _choose_batch_tile(batch, num_fields, embed_dim, itemsize,
                       target_tile_bytes=2 * 1024 * 1024, max_rows=2048):
    """Pick a batch tile size (multiple of 8) from a per-tile VMEM byte budget."""
    bytes_per_row = num_fields * embed_dim * itemsize
    tb = int(max(8, min(max_rows, target_tile_bytes // bytes_per_row)))
    tb -= tb % 8
    # Never larger than the (8-rounded) batch itself.
    b_round8 = -(-batch // 8) * 8
    return min(tb, b_round8)


@functools.partial(jax.jit, static_argnames=())
def fm_layer_dense(x: jax.Array) -> jax.Array:
    """x: (B, F, D) array -> (B,) second-order FM interaction."""
    B, F, D = x.shape
    tb = _choose_batch_tile(B, F, D, x.dtype.itemsize)

    # Pad batch so the tile evenly divides it (zero rows contribute exactly 0).
    pad = (-B) % tb
    if pad:
        x = jnp.pad(x, ((0, pad), (0, 0), (0, 0)))
    b_padded = B + pad
    num_tiles = b_padded // tb

    out = pl.pallas_call(
        fm_dense_kernel,
        out_shape=jax.ShapeDtypeStruct((b_padded, 1), x.dtype),
        grid_spec=pltpu.PrefetchScalarGridSpec(
            num_scalar_prefetch=0,
            grid=(num_tiles,),
            in_specs=[pl.BlockSpec((tb, F, D), lambda i: (i, 0, 0))],
            out_specs=pl.BlockSpec((tb, 1), lambda i: (i, 0)),
        ),
        compiler_params=pltpu.CompilerParams(
            # Batch tiles are independent -> shard across TCs on megacore/v7x.
            dimension_semantics=("parallel",),
            # Explicit scoped-VMEM budget; 32 MiB is safe on v5e/v6e/v7x and is
            # far above the ~4-5 MiB this kernel double-buffers.
            vmem_limit_bytes=32 * 1024 * 1024,
        ),
    )(x)
    return out[:B, 0]


def fm_layer_dense_ref(x: jax.Array) -> jax.Array:
    """Pure-JAX reference matching the PyTorch module exactly."""
    square_of_sum = jnp.square(jnp.sum(x, axis=1))
    sum_of_square = jnp.sum(jnp.square(x), axis=1)
    return 0.5 * jnp.sum(square_of_sum - sum_of_square, axis=1)


if __name__ == "__main__":
    key = jax.random.PRNGKey(0)

    # Small shape matching the module convention: (batch, num_fields, embed_dim).
    B, F, D = 2, 4, 32
    x_small = jax.random.normal(key, (B, F, D), dtype=jnp.float32)
    out_small = jax.block_until_ready(fm_layer_dense(x_small))
    ref_small = jax.block_until_ready(fm_layer_dense_ref(x_small))
    assert out_small.shape == (B,), out_small.shape
    assert jnp.allclose(out_small, ref_small, atol=1e-3, rtol=1e-4), (out_small, ref_small)

    # Second config exercising multi-tile pipelining + tail padding
    # (B not a multiple of the chosen tile).
    key2 = jax.random.PRNGKey(0)
    B2, F2, D2 = 1000, 10, 128
    x_big = jax.random.normal(key2, (B2, F2, D2), dtype=jnp.float32)
    out_big = jax.block_until_ready(fm_layer_dense(x_big))
    ref_big = jax.block_until_ready(fm_layer_dense_ref(x_big))
    assert out_big.shape == (B2,), out_big.shape
    assert jnp.allclose(out_big, ref_big, atol=1e-3, rtol=1e-4)

    print("KERNEL_OK")
</pallas_src>

<mosaic_0001>
module attributes {stable_mosaic.version = 11 : i64} {
  func.func @fm_dense_kernel(%arg0: i32, %arg1: memref<8x4x32xf32, #tpu.memory_space<vmem>>, %arg2: memref<8x1xf32, #tpu.memory_space<vmem>>) attributes {dimension_semantics = [#tpu.dimension_semantics<parallel>], iteration_bounds = array<i64: 1>, scalar_prefetch = 0 : i64, scratch_operands = 0 : i64, tpu.core_type = #tpu.core_type<tc>, window_params = [{transform_indices = @transform_0, window_bounds = array<i64: 8, 4, 32>}, {transform_indices = @transform_1, window_bounds = array<i64: 8, 1>}]} {
    %c0 = arith.constant 0 : index
    %c0_0 = arith.constant 0 : index
    %c0_1 = arith.constant 0 : index
    %0 = vector.load %arg1[%c0, %c0_0, %c0_1] : memref<8x4x32xf32, #tpu.memory_space<vmem>>, vector<8x1x32xf32>
    %1 = vector.shape_cast %0 : vector<8x1x32xf32> to vector<8x32xf32>
    %2 = arith.mulf %1, %1 : vector<8x32xf32>
    %c0_2 = arith.constant 0 : index
    %c1 = arith.constant 1 : index
    %c0_3 = arith.constant 0 : index
    %3 = vector.load %arg1[%c0_2, %c1, %c0_3] : memref<8x4x32xf32, #tpu.memory_space<vmem>>, vector<8x1x32xf32>
    %4 = vector.shape_cast %3 : vector<8x1x32xf32> to vector<8x32xf32>
    %5 = arith.addf %1, %4 : vector<8x32xf32>
    %6 = arith.mulf %4, %4 : vector<8x32xf32>
    %7 = arith.addf %2, %6 : vector<8x32xf32>
    %c0_4 = arith.constant 0 : index
    %c2 = arith.constant 2 : index
    %c0_5 = arith.constant 0 : index
    %8 = vector.load %arg1[%c0_4, %c2, %c0_5] : memref<8x4x32xf32, #tpu.memory_space<vmem>>, vector<8x1x32xf32>
    %9 = vector.shape_cast %8 : vector<8x1x32xf32> to vector<8x32xf32>
    %10 = arith.addf %5, %9 : vector<8x32xf32>
    %11 = arith.mulf %9, %9 : vector<8x32xf32>
    %12 = arith.addf %7, %11 : vector<8x32xf32>
    %c0_6 = arith.constant 0 : index
    %c3 = arith.constant 3 : index
    %c0_7 = arith.constant 0 : index
    %13 = vector.load %arg1[%c0_6, %c3, %c0_7] : memref<8x4x32xf32, #tpu.memory_space<vmem>>, vector<8x1x32xf32>
    %14 = vector.shape_cast %13 : vector<8x1x32xf32> to vector<8x32xf32>
    %15 = arith.addf %10, %14 : vector<8x32xf32>
    %16 = arith.mulf %14, %14 : vector<8x32xf32>
    %17 = arith.addf %12, %16 : vector<8x32xf32>
    %18 = arith.mulf %15, %15 : vector<8x32xf32>
    %19 = arith.subf %18, %17 : vector<8x32xf32>
    %cst = arith.constant dense<0.000000e+00> : vector<8xf32>
    %20 = vector.multi_reduction <add>, %19, %cst [1] : vector<8x32xf32> to vector<8xf32>
    %21 = vector.shape_cast %20 : vector<8xf32> to vector<8x1xf32>
    %cst_8 = arith.constant 5.000000e-01 : f32
    %22 = vector.broadcast %cst_8 : f32 to vector<8x1xf32>
    %23 = arith.mulf %22, %21 : vector<8x1xf32>
    %c0_9 = arith.constant 0 : index
    %c0_10 = arith.constant 0 : index
    %24 = vector.load %arg2[%c0_9, %c0_10] : memref<8x1xf32, #tpu.memory_space<vmem>>, vector<8x1xf32>
    tpu.vector_store %arg2[%c0_9, %c0_10], %23 {strides = array<i32>} : memref<8x1xf32, #tpu.memory_space<vmem>>, vector<8x1xf32>,
    return
  }
  func.func @transform_0(%arg0: i32) -> (i32, i32, i32) {
    %c0_i32 = arith.constant 0 : i32
    %c0_i32_0 = arith.constant 0 : i32
    %c0_i32_1 = arith.constant 0 : i32
    return %arg0, %c0_i32, %c0_i32_0 : i32, i32, i32
  }
  func.func @transform_1(%arg0: i32) -> (i32, i32) {
    %c0_i32 = arith.constant 0 : i32
    %c0_i32_0 = arith.constant 0 : i32
    return %arg0, %c0_i32 : i32, i32
  }
}

</mosaic_0001>

<bundles_post_ra>
// kernel: fm_layer_dense.1
= control target key start
LH: loop header
LB: loop body
LE: loop exit
PB: predicated region body
PF: predicated region fallthrough
CT: control target
= control target key end

     0   :  { %vm145_vm0 = vcmask 1041409   ;;  %vm148_vm1 = vcmask 1042434   ;;  %vm151_vm2 = vcmask 1043459   ;;  %vm154_vm3 = vcmask 1044484   ;;  %s287_s0 = inlined_call_operand.vmem [shape: f32[8,4,32], index: 0, kind: input, shape index: {}]   ;;  %s288_s1 = inlined_call_operand.vmem [shape: f32[8,1], index: 1, kind: output, shape index: {}]  }
   0x1   :  { %v8_v0 = vld [vmem:[%s287_s0] sm:$0x1]  ;;  %v9_v1 = vld [vmem:[%s287_s0 + $0x4] sm:$0x1]  ;;  %v10_v2 = vld [vmem:[%s287_s0 + $0x8] sm:$0x1] }
   0x2   :  { %v11_v3 = vld [vmem:[%s287_s0 + $0xc] sm:$0x1]  ;;  %v12_v4 = vld [vmem:[%s287_s0 + $0x10] sm:$0x1]  ;;  %v13_v5 = vld [vmem:[%s287_s0 + $0x14] sm:$0x1]  ;;  %v16_v6 = vmul.f32 %v8_v0, %v8_v0  ;;  %v17_v7 = vmul.f32 %v9_v1, %v9_v1  ;;  %v18_v10 = vmul.f32 %v10_v2, %v10_v2 }
   0x3   :  { %v14_v8 = vld [vmem:[%s287_s0 + $0x18] sm:$0x1]  ;;  %v15_v9 = vld [vmem:[%s287_s0 + $0x1c] sm:$0x1]  ;;  %v19_v11 = vmul.f32 %v11_v3, %v11_v3  ;;  %v20_v12 = vmul.f32 %v12_v4, %v12_v4  ;;  %v21_v13 = vmul.f32 %v13_v5, %v13_v5  ;;  %v24_v14 = vld [vmem:[%s287_s0 + $0x1] sm:$0x1] }
   0x4   :  { %v22_v15 = vmul.f32 %v14_v8, %v14_v8  ;;  %v23_v16 = vmul.f32 %v15_v9, %v15_v9  ;;  %v25_v17 = vld [vmem:[%s287_s0 + $0x5] sm:$0x1]  ;;  %v26_v18 = vld [vmem:[%s287_s0 + $0x9] sm:$0x1]  ;;  %v27_v19 = vld [vmem:[%s287_s0 + $0xd] sm:$0x1]  ;;  %v32_v20 = vadd.f32 %v24_v14, %v8_v0  ;;  %v40_v21 = vmul.f32 %v24_v14, %v24_v14 }
   0x5   :  { %v28_v22 = vld [vmem:[%s287_s0 + $0x11] sm:$0x1]  ;;  %v29_v23 = vld [vmem:[%s287_s0 + $0x15] sm:$0x1]  ;;  %v30_v24 = vld [vmem:[%s287_s0 + $0x19] sm:$0x1]  ;;  %v33_v25 = vadd.f32 %v25_v17, %v9_v1  ;;  %v34_v26 = vadd.f32 %v26_v18, %v10_v2  ;;  %v35_v27 = vadd.f32 %v27_v19, %v11_v3  ;;  %v41_v28 = vmul.f32 %v25_v17, %v25_v17 }
   0x6   :  { %v31_v29 = vld [vmem:[%s287_s0 + $0x1d] sm:$0x1]  ;;  %v36_v30 = vadd.f32 %v28_v22, %v12_v4  ;;  %v37_v31 = vadd.f32 %v29_v23, %v13_v5  ;;  %v38_v32 = vadd.f32 %v30_v24, %v14_v8  ;;  %v42_v33 = vmul.f32 %v26_v18, %v26_v18  ;;  %v56_v38 = vld [vmem:[%s287_s0 + $0x2] sm:$0x1]  ;;  %v57_v39 = vld [vmem:[%s287_s0 + $0x6] sm:$0x1] }
   0x7   :  { %v39_v34 = vadd.f32 %v31_v29, %v15_v9  ;;  %v43_v35 = vmul.f32 %v27_v19, %v27_v19  ;;  %v44_v36 = vmul.f32 %v28_v22, %v28_v22  ;;  %v45_v37 = vmul.f32 %v29_v23, %v29_v23  ;;  %v58_v40 = vld [vmem:[%s287_s0 + $0xa] sm:$0x1]  ;;  %v59_v45 = vld [vmem:[%s287_s0 + $0xe] sm:$0x1]  ;;  %v60_v46 = vld [vmem:[%s287_s0 + $0x12] sm:$0x1] }
   0x8   :  { %v46_v41 = vmul.f32 %v30_v24, %v30_v24  ;;  %v47_v42 = vmul.f32 %v31_v29, %v31_v29  ;;  %v48_v43 = vadd.f32 %v40_v21, %v16_v6  ;;  %v49_v44 = vadd.f32 %v41_v28, %v17_v7  ;;  %v61_v47 = vld [vmem:[%s287_s0 + $0x16] sm:$0x1]  ;;  %v62_v52 = vld [vmem:[%s287_s0 + $0x1a] sm:$0x1]  ;;  %v63_v53 = vld [vmem:[%s287_s0 + $0x1e] sm:$0x1] }
   0x9   :  { %v50_v48 = vadd.f32 %v42_v33, %v18_v10  ;;  %v51_v49 = vadd.f32 %v43_v35, %v19_v11  ;;  %v52_v50 = vadd.f32 %v44_v36, %v20_v12  ;;  %v53_v51 = vadd.f32 %v45_v37, %v21_v13  ;;  %v88_v6 = vld [vmem:[%s287_s0 + $0x3] sm:$0x1]  ;;  %v89_v7 = vld [vmem:[%s287_s0 + $0x7] sm:$0x1]  ;;  %v90_v8 = vld [vmem:[%s287_s0 + $0xb] sm:$0x1] }
   0xa   :  { %v54_v54 = vadd.f32 %v46_v41, %v22_v15  ;;  %v55_v55 = vadd.f32 %v47_v42, %v23_v16  ;;  %v64_v56 = vadd.f32 %v56_v38, %v32_v20  ;;  %v65_v57 = vadd.f32 %v57_v39, %v33_v25  ;;  %v91_v13 = vld [vmem:[%s287_s0 + $0xf] sm:$0x1]  ;;  %v92_v14 = vld [vmem:[%s287_s0 + $0x13] sm:$0x1]  ;;  %v93_v15 = vld [vmem:[%s287_s0 + $0x17] sm:$0x1] }
   0xb   :  { %v66_v58 = vadd.f32 %v58_v40, %v34_v26  ;;  %v67_v59 = vadd.f32 %v59_v45, %v35_v27  ;;  %v68_v60 = vadd.f32 %v60_v46, %v36_v30  ;;  %v69_v61 = vadd.f32 %v61_v47, %v37_v31  ;;  %v94_v20 = vld [vmem:[%s287_s0 + $0x1b] sm:$0x1]  ;;  %v95_v21 = vld [vmem:[%s287_s0 + $0x1f] sm:$0x1] }
   0xc   :  { %v70_v62 = vadd.f32 %v62_v52, %v38_v32  ;;  %v71_v63 = vadd.f32 %v63_v53, %v39_v34  ;;  %v72_v0 = vmul.f32 %v56_v38, %v56_v38  ;;  %v73_v1 = vmul.f32 %v57_v39, %v57_v39 }
   0xd   :  { %v74_v2 = vmul.f32 %v58_v40, %v58_v40  ;;  %v75_v3 = vmul.f32 %v59_v45, %v59_v45  ;;  %v76_v4 = vmul.f32 %v60_v46, %v60_v46  ;;  %v77_v5 = vmul.f32 %v61_v47, %v61_v47 }
   0xe   :  { %v78_v9 = vmul.f32 %v62_v52, %v62_v52  ;;  %v79_v10 = vmul.f32 %v63_v53, %v63_v53  ;;  %v80_v11 = vadd.f32 %v72_v0, %v48_v43  ;;  %v81_v12 = vadd.f32 %v73_v1, %v49_v44 }
   0xf   :  { %v82_v16 = vadd.f32 %v74_v2, %v50_v48  ;;  %v83_v17 = vadd.f32 %v75_v3, %v51_v49  ;;  %v84_v18 = vadd.f32 %v76_v4, %v52_v50  ;;  %v85_v19 = vadd.f32 %v77_v5, %v53_v51 }
  0x10   :  { %v86_v22 = vadd.f32 %v78_v9, %v54_v54  ;;  %v87_v23 = vadd.f32 %v79_v10, %v55_v55  ;;  %v96_v24 = vadd.f32 %v88_v6, %v64_v56  ;;  %v97_v25 = vadd.f32 %v89_v7, %v65_v57 }
  0x11   :  { %v98_v26 = vadd.f32 %v90_v8, %v66_v58  ;;  %v99_v27 = vadd.f32 %v91_v13, %v67_v59  ;;  %v100_v28 = vadd.f32 %v92_v14, %v68_v60  ;;  %v101_v29 = vadd.f32 %v93_v15, %v69_v61 }
  0x12   :  { %v102_v30 = vadd.f32 %v94_v20, %v70_v62  ;;  %v103_v31 = vadd.f32 %v95_v21, %v71_v63  ;;  %v104_v32 = vmul.f32 %v88_v6, %v88_v6  ;;  %v105_v33 = vmul.f32 %v89_v7, %v89_v7 }
  0x13   :  { %v106_v34 = vmul.f32 %v90_v8, %v90_v8  ;;  %v107_v35 = vmul.f32 %v91_v13, %v91_v13  ;;  %v108_v36 = vmul.f32 %v92_v14, %v92_v14  ;;  %v109_v37 = vmul.f32 %v93_v15, %v93_v15 }
  0x14   :  { %v110_v38 = vmul.f32 %v94_v20, %v94_v20  ;;  %v111_v39 = vmul.f32 %v95_v21, %v95_v21  ;;  %v112_v40 = vadd.f32 %v104_v32, %v80_v11  ;;  %v113_v41 = vadd.f32 %v105_v33, %v81_v12 }
  0x15   :  { %v114_v42 = vadd.f32 %v106_v34, %v82_v16  ;;  %v115_v43 = vadd.f32 %v107_v35, %v83_v17  ;;  %v116_v44 = vadd.f32 %v108_v36, %v84_v18  ;;  %v117_v45 = vadd.f32 %v109_v37, %v85_v19 }
  0x16   :  { %v118_v46 = vadd.f32 %v110_v38, %v86_v22  ;;  %v119_v47 = vadd.f32 %v111_v39, %v87_v23  ;;  %v120_v48 = vmul.f32 %v96_v24, %v96_v24  ;;  %v121_v49 = vmul.f32 %v97_v25, %v97_v25 }
  0x17   :  { %v122_v50 = vmul.f32 %v98_v26, %v98_v26  ;;  %v123_v51 = vmul.f32 %v99_v27, %v99_v27  ;;  %v124_v52 = vmul.f32 %v100_v28, %v100_v28  ;;  %v125_v53 = vmul.f32 %v101_v29, %v101_v29 }
  0x18   :  { %v126_v54 = vmul.f32 %v102_v30, %v102_v30  ;;  %v127_v55 = vmul.f32 %v103_v31, %v103_v31  ;;  %v128_v56 = vsub.f32 %v120_v48, %v112_v40  ;;  %v129_v57 = vsub.f32 %v121_v49, %v113_v41 }
  0x19   :  { %v130_v58 = vsub.f32 %v122_v50, %v114_v42  ;;  %v131_v59 = vsub.f32 %v123_v51, %v115_v43  ;;  %v132_v60 = vsub.f32 %v124_v52, %v116_v44  ;;  %v133_v61 = vsub.f32 %v125_v53, %v117_v45 }
  0x1a   :  { %v134_v62 = vsub.f32 %v126_v54, %v118_v46  ;;  %v135_v63 = vsub.f32 %v127_v55, %v119_v47  ;;  %v144_v0 = vrot.slane %v129_v57, 7  ;;  %vm157_vm4 = vcmask 1045509  }
  0x1b   :  { %v147_v1 = vrot.slane %v130_v58, 6  ;;  %v150_v2 = vrot.slane %v131_v59, 5  ;;  %v153_v3 = vrot.slane %v132_v60, 4  ;;  %v156_v5 = vrot.slane %v133_v61, 3 }
  0x1c   :  { %v146_v4 = vsel %vm145_vm0, %v144_v0, %v128_v56  ;;  %v159_v7 = vrot.slane %v134_v62, 2  ;;  %vm160_vm5 = vcmask 1046534   ;;  %v162_v9 = vrot.slane %v135_v63, 1 }
  0x1d   :  { %v149_v6 = vsel %vm148_vm1, %v147_v1, %v146_v4  ;;  %vm163_vm6 = vcmask 1047559   ;;  %vm166_vm7 = vcmask 261120   ;;  %vm171_vm8 = vcmask 7168  }
  0x1e   :  { %v152_v8 = vsel %vm151_vm2, %v150_v2, %v149_v6 }
  0x1f   :  { %v155_v10 = vsel %vm154_vm3, %v153_v3, %v152_v8 }
  0x20   :  { %v158_v11 = vsel %vm157_vm4, %v156_v5, %v155_v10 }
  0x21   :  { %v161_v12 = vsel %vm160_vm5, %v159_v7, %v158_v11 }
  0x22   :  { %v164_v13 = vsel %vm163_vm6, %v162_v9, %v161_v12 }
  0x23   :  { %v167_v14 = vsel %vm166_vm7, %v164_v13, 0.0 }
  0x24   :  { %168 = vadd.xlane.f32.xlu0 %v167_v14 }
  0xb1   :  { %v169_v15 = vpop.xlane.xlu0 %168 }
  0xb2   :  { %v170_v16 = vmul.f32 0.5, %v169_v15 }
  0xb4   :  { %172 = vst.msk [vmem:[%s288_s1] sm:$0xff] %vm171_vm8, %v170_v16 }

</bundles_post_ra>
